<compile_context>
chip_gen: v7x
topology: tpu7x:2x2x1
jax: 0.10.0
libtpu: 0.0.40
codegen_flags: <defaults>
</compile_context>

<pallas_src>
import jax
import jax.numpy as jnp
from jax.experimental import pallas as pl
from jax.experimental.pallas import tpu as pltpu

BN_EPS = 1e-5
LANE = 128


def _round_up(n, m):
    return -(-n // m) * m


# ----------------------------------------------------------------------------
# Kernel
# ----------------------------------------------------------------------------
def _make_dqn_kernel(padded_out_dims):
    """Fused kernel: per layer `relu(x @ W + b)`, no ReLU on the last layer.

    All widths are pre-padded to multiples of 128, so every matmul, bias add,
    and store is lane-dense.  Activations are bf16 into the MXU, f32 out.
    """
    num_layers = len(padded_out_dims)

    def kernel(x_ref, b_ref, *rest):
        o_ref = rest[-1]
        w_refs = rest[:-1]
        h = x_ref[...]                              # already bf16, lane-dense
        y = None
        for j, w_ref in enumerate(w_refs):
            wp = padded_out_dims[j]
            # bf16 x bf16 matmul on the MXU, f32 accumulate.
            y = jnp.dot(h, w_ref[...], preferred_element_type=jnp.float32)
            y = y + b_ref[j:j + 1, :wp]             # 128-aligned static slice
            if j < num_layers - 1:
                y = jnp.maximum(y, 0.0)             # ReLU (BN folded into next W/b)
                h = y.astype(jnp.bfloat16)
        o_ref[...] = y.astype(o_ref.dtype)

    return kernel


# ----------------------------------------------------------------------------
# Parameter prep (one-time constant folds, outside the per-call hot path)
# ----------------------------------------------------------------------------
def init_dqn_params(key, input_dim, hidden_dims, output_dim,
                    randomize_bn_state=False):
    """Parameter init matching the PyTorch module (kaiming_normal_, zero bias).

    If `randomize_bn_state` is set, BatchNorm running stats / affine params are
    randomized (as if loaded from a trained checkpoint) so the BN fold is
    exercised non-trivially.
    """
    params = []
    prev = input_dim
    for h in hidden_dims:
        key, wk, k1, k2, k3, k4 = jax.random.split(key, 6)
        std = (2.0 / prev) ** 0.5              # kaiming_normal_, fan_in, gain sqrt(2)
        w = jax.random.normal(wk, (prev, h), dtype=jnp.float32) * std  # (in, out)
        b = jnp.zeros((1, h), jnp.float32)
        if randomize_bn_state:
            gamma = 1.0 + 0.1 * jax.random.normal(k1, (1, h), jnp.float32)
            beta = 0.1 * jax.random.normal(k2, (1, h), jnp.float32)
            run_mean = 0.1 * jax.random.normal(k3, (1, h), jnp.float32)
            run_var = jax.random.uniform(k4, (1, h), jnp.float32, 0.5, 1.5)
        else:
            gamma = jnp.ones((1, h), jnp.float32)
            beta = jnp.zeros((1, h), jnp.float32)
            run_mean = jnp.zeros((1, h), jnp.float32)
            run_var = jnp.ones((1, h), jnp.float32)
        params.append((w, b, gamma, beta, run_mean, run_var))
        prev = h
    key, wk = jax.random.split(key)
    std = (2.0 / prev) ** 0.5
    w_out = jax.random.normal(wk, (prev, output_dim), dtype=jnp.float32) * std
    b_out = jnp.zeros((1, output_dim), jnp.float32)
    params.append((w_out, b_out))
    return params


def fold_bn_into_linears(params):
    """Fold each eval-mode BN affine into the *following* Linear (all in f32).

    Block i: h = scale_i * relu(x @ W_i + b_i) + shift_i, with
      scale = gamma * rsqrt(running_var + eps), shift = beta - running_mean * scale.
    Folding into the next Linear: W'_{i+1} = scale_i[:, None] * W_{i+1},
    b'_{i+1} = b_{i+1} + shift_i @ W_{i+1}.  Result: plain matmul+bias(+ReLU) stack.
    """
    num_hidden = len(params) - 1
    weights, biases = [], []
    scale = None
    shift = None
    for i in range(num_hidden):
        w, b, gamma, beta, rm, rv = params[i]
        if scale is not None:
            b = b + shift @ w
            w = scale.reshape(-1, 1) * w
        weights.append(w)
        biases.append(b)
        inv_std = jax.lax.rsqrt(rv + BN_EPS)
        scale = gamma * inv_std
        shift = beta - rm * scale
    w_out, b_out = params[-1]
    if scale is not None:
        b_out = b_out + shift @ w_out
        w_out = scale.reshape(-1, 1) * w_out
    weights.append(w_out)
    biases.append(b_out)
    return weights, biases


def pack_params(weights_f32, biases):
    """Zero-pad every layer width up to a multiple of 128 lanes, cast weights
    to bf16, and pack all biases into one (L, max_padded_width) f32 array."""
    padded_weights = []
    out_dims, padded_out_dims = [], []
    for w in weights_f32:
        din, dout = int(w.shape[0]), int(w.shape[1])
        din_p, dout_p = _round_up(din, LANE), _round_up(dout, LANE)
        w_p = jnp.zeros((din_p, dout_p), jnp.float32).at[:din, :dout].set(w)
        padded_weights.append(w_p.astype(jnp.bfloat16))
        out_dims.append(dout)
        padded_out_dims.append(dout_p)
    max_w = max(padded_out_dims)
    b_packed = jnp.zeros((len(weights_f32), max_w), jnp.float32)
    for j, b in enumerate(biases):
        b_packed = b_packed.at[j, :b.shape[1]].set(b[0])
    return (tuple(padded_weights), b_packed, tuple(out_dims),
            tuple(padded_out_dims))


# ----------------------------------------------------------------------------
# Pallas wrapper
# ----------------------------------------------------------------------------
def _padded_tile_bytes(shape, dtype):
    lead = 1
    for d in shape[:-2]:
        lead *= int(d)
    sub = _round_up(int(shape[-2]), 8)
    lane = _round_up(int(shape[-1]), LANE)
    return lead * sub * lane * jnp.dtype(dtype).itemsize


def _vmem_cap_bytes():
    """Generation-aware VMEM budget: ~75% of physical per-core VMEM
    (~96 MiB on v5e/v6e's 128 MiB, ~48 MiB on v7x's 64 MiB)."""
    phys = 64 * 1024 * 1024                      # conservative fallback (v7x)
    try:
        info = pltpu.get_tpu_info()
        phys = int(getattr(info, "vmem_capacity_bytes", phys))
    except Exception:
        pass
    return (3 * phys) // 4


def _choose_batch_tile(batch):
    """>= 2 grid steps once batch > 8 (v7x dual-TC sharding), capped at 512
    rows (better HBM-roofline fill for large batches)."""
    batch8 = _round_up(batch, 8)
    if batch8 <= 8:
        return batch8
    return min(512, _round_up(pl.cdiv(batch8, 2), 8))


def _build_call(kernel, *, grid, tb, in_pad, out_pad, bias_shape,
                weight_shapes, batch_p, single_buffer, vmem_limit):
    if single_buffer:
        def const_spec(shape):
            # Constant index_map -> fetched once; one buffer is enough.
            return pl.BlockSpec(shape, lambda i: (0, 0),
                                pipeline_mode=pl.Buffered(1))
    else:
        def const_spec(shape):
            return pl.BlockSpec(shape, lambda i: (0, 0))
    in_specs = ([pl.BlockSpec((tb, in_pad), lambda i: (i, 0)),
                 const_spec(bias_shape)]
                + [const_spec(ws) for ws in weight_shapes])
    return pl.pallas_call(
        kernel,
        out_shape=jax.ShapeDtypeStruct((batch_p, out_pad), jnp.float32),
        grid=grid,
        in_specs=in_specs,
        out_specs=pl.BlockSpec((tb, out_pad), lambda i: (i, 0)),
        compiler_params=pltpu.CompilerParams(
            dimension_semantics=("parallel",),
            vmem_limit_bytes=vmem_limit),
    )


def dqn_forward(x, b_packed, weights, out_dims, padded_out_dims):
    """Fused DQNPolicy eval-mode forward via a single pallas_call."""
    batch, input_dim = x.shape
    in_pad = int(weights[0].shape[0])
    out_pad = int(padded_out_dims[-1])
    output_dim = int(out_dims[-1])

    tb = _choose_batch_tile(batch)
    batch_p = _round_up(_round_up(batch, 8), tb)
    grid = (batch_p // tb,)

    # Lane-dense bf16 input slab (zero rows/cols beyond the real data; padded
    # tail rows compute harmless values that the wrapper slice drops).
    x_p = jnp.zeros((batch_p, in_pad), jnp.bfloat16)
    x_p = x_p.at[:batch, :input_dim].set(x.astype(jnp.bfloat16))

    # VMEM budget: resident weights + bias (single- or double-buffered) plus
    # double-buffered x/out streaming tiles, with headroom, capped per chip.
    const_bytes = (sum(_padded_tile_bytes(w.shape, w.dtype) for w in weights)
                   + _padded_tile_bytes(b_packed.shape, b_packed.dtype))
    stream_bytes = 2 * (_padded_tile_bytes((tb, in_pad), jnp.bfloat16)
                        + _padded_tile_bytes((tb, out_pad), jnp.float32))
    cap = _vmem_cap_bytes()

    def vmem_limit(n_const_buffers):
        need = n_const_buffers * const_bytes + stream_bytes
        if need > cap:
            # TODO(synk): tile the output-feature axis with Blocked specs when
            #             the weight stack outgrows whole-layer VMEM residency.
            raise ValueError("weight stack exceeds the per-core VMEM budget")
        return min(cap, max(32 * 1024 * 1024, (5 * need) // 4 + (1 << 20)))

    kernel = _make_dqn_kernel(padded_out_dims)
    weight_shapes = tuple(w.shape for w in weights)
    limit_single = vmem_limit(1)
    try:
        out_p = _build_call(
            kernel, grid=grid, tb=tb, in_pad=in_pad, out_pad=out_pad,
            bias_shape=b_packed.shape, weight_shapes=weight_shapes,
            batch_p=batch_p, single_buffer=True, vmem_limit=limit_single,
        )(x_p, b_packed, *weights)
    except Exception:
        # Fallback for JAX versions that reject pipeline_mode=pl.Buffered(1):
        # default double-buffered constant specs (costs extra VMEM only).
        out_p = _build_call(
            kernel, grid=grid, tb=tb, in_pad=in_pad, out_pad=out_pad,
            bias_shape=b_packed.shape, weight_shapes=weight_shapes,
            batch_p=batch_p, single_buffer=False, vmem_limit=vmem_limit(2),
        )(x_p, b_packed, *weights)

    # Slice the lane-dense output slab back to the real (batch, output_dim).
    return out_p[:batch, :output_dim]


# ----------------------------------------------------------------------------
# References (correctness checks)
# ----------------------------------------------------------------------------
def dqn_forward_ref(x, params):
    """Unfused eval-mode module semantics in f32 (Linear->ReLU->BN->Dropout)."""
    h = x.astype(jnp.float32)
    for layer in params[:-1]:
        w, b, gamma, beta, rm, rv = layer
        y = jnp.maximum(h @ w + b, 0.0)
        h = (y - rm) / jnp.sqrt(rv + BN_EPS) * gamma + beta
    w, b = params[-1]
    return h @ w + b


def dqn_forward_folded_ref(x, weights, biases):
    """Plain-JAX mirror of the kernel math (inputs cast to the weight dtype
    before every matmul, f32 accumulation, ReLU on all but the last layer)."""
    num_layers = len(weights)
    h = x.astype(weights[0].dtype)
    out = None
    for j, (w, b) in enumerate(zip(weights, biases)):
        y = jnp.dot(h, w, preferred_element_type=jnp.float32) + b
        if j < num_layers - 1:
            y = jnp.maximum(y, 0.0)
            h = y.astype(w.dtype)
        out = y
    return out


if __name__ == "__main__":
    # Small shapes consistent with the module: flat feature-vector input.
    batch = 8
    input_dim = 32
    hidden_dims = [64, 32]
    output_dim = 4  # number of actions

    key = jax.random.PRNGKey(0)
    key, xk = jax.random.split(key)
    x = jax.random.normal(xk, (batch, input_dim), dtype=jnp.float32)

    params = init_dqn_params(key, input_dim, hidden_dims, output_dim,
                             randomize_bn_state=True)

    # One-time parameter prep: fold BN, pad widths to 128 lanes, cast to bf16,
    # pack biases into a single array.
    weights_f32, biases = fold_bn_into_linears(params)
    weights_bf16, b_packed, out_dims, padded_out_dims = pack_params(
        weights_f32, biases)

    out = dqn_forward(x, b_packed, weights_bf16, out_dims, padded_out_dims)
    out = jax.block_until_ready(out)
    assert out.shape == (batch, output_dim), out.shape

    # Check 1: BN fold is exact (f32 folded stack vs unfused module semantics).
    ref_module = dqn_forward_ref(x, params)
    ref_folded_f32 = dqn_forward_folded_ref(x, weights_f32, biases)
    assert jnp.allclose(ref_folded_f32, ref_module, atol=1e-4, rtol=1e-4), (
        float(jnp.max(jnp.abs(ref_folded_f32 - ref_module))))

    # Check 2: Pallas kernel matches the same math with bf16 weights/inputs
    # (lane padding is all exact zeros, so it must not change the numerics).
    weights_bf16_unpadded = [w.astype(jnp.bfloat16) for w in weights_f32]
    ref_folded_bf16 = dqn_forward_folded_ref(x, weights_bf16_unpadded, biases)
    assert jnp.allclose(out, ref_folded_bf16, atol=2e-3, rtol=2e-3), (
        float(jnp.max(jnp.abs(out - ref_folded_bf16))))

    print("KERNEL_OK")
</pallas_src>

<mosaic_0001>
module attributes {stable_mosaic.version = 11 : i64} {
  func.func @kernel(%arg0: i32, %arg1: memref<8x128xbf16, #tpu.memory_space<vmem>>, %arg2: memref<3x128xf32, #tpu.memory_space<vmem>>, %arg3: memref<128x128xbf16, #tpu.memory_space<vmem>>, %arg4: memref<128x128xbf16, #tpu.memory_space<vmem>>, %arg5: memref<128x128xbf16, #tpu.memory_space<vmem>>, %arg6: memref<8x128xf32, #tpu.memory_space<vmem>>) attributes {dimension_semantics = [#tpu.dimension_semantics<parallel>], iteration_bounds = array<i64: 1>, scalar_prefetch = 0 : i64, scratch_operands = 0 : i64, tpu.core_type = #tpu.core_type<tc>, window_params = [{transform_indices = @transform_0, window_bounds = array<i64: 8, 128>}, {pipeline_mode = #tpu.pipeline_mode<synchronous>, transform_indices = @transform_1, window_bounds = array<i64: 3, 128>}, {pipeline_mode = #tpu.pipeline_mode<synchronous>, transform_indices = @transform_2, window_bounds = array<i64: 128, 128>}, {pipeline_mode = #tpu.pipeline_mode<synchronous>, transform_indices = @transform_3, window_bounds = array<i64: 128, 128>}, {pipeline_mode = #tpu.pipeline_mode<synchronous>, transform_indices = @transform_4, window_bounds = array<i64: 128, 128>}, {transform_indices = @transform_5, window_bounds = array<i64: 8, 128>}]} {
    %c0 = arith.constant 0 : index
    %c0_0 = arith.constant 0 : index
    %0 = vector.load %arg1[%c0, %c0_0] : memref<8x128xbf16, #tpu.memory_space<vmem>>, vector<8x128xbf16>
    %c0_1 = arith.constant 0 : index
    %c0_2 = arith.constant 0 : index
    %1 = vector.load %arg3[%c0_1, %c0_2] : memref<128x128xbf16, #tpu.memory_space<vmem>>, vector<128x128xbf16>
    %cst = arith.constant dense<0.000000e+00> : vector<8x128xf32>
    %2 = tpu.matmul %0, %1, %cst {dimension_numbers = #tpu.dot_dimension_numbers<[1], [0], [0], [1], [0, 0, 1, 1], [], []>} : vector<8x128xbf16>, vector<128x128xbf16>, vector<8x128xf32> -> vector<8x128xf32>
    %c0_3 = arith.constant 0 : index
    %c0_4 = arith.constant 0 : index
    %3 = vector.load %arg2[%c0_3, %c0_4] : memref<3x128xf32, #tpu.memory_space<vmem>>, vector<1x128xf32>
    %4 = vector.broadcast %3 : vector<1x128xf32> to vector<8x128xf32>
    %5 = arith.addf %2, %4 : vector<8x128xf32>
    %cst_5 = arith.constant 0.000000e+00 : f32
    %6 = vector.broadcast %cst_5 : f32 to vector<8x128xf32>
    %7 = arith.maximumf %5, %6 : vector<8x128xf32>
    %8 = arith.truncf %7 : vector<8x128xf32> to vector<8x128xbf16>
    %c0_6 = arith.constant 0 : index
    %c0_7 = arith.constant 0 : index
    %9 = vector.load %arg4[%c0_6, %c0_7] : memref<128x128xbf16, #tpu.memory_space<vmem>>, vector<128x128xbf16>
    %cst_8 = arith.constant dense<0.000000e+00> : vector<8x128xf32>
    %10 = tpu.matmul %8, %9, %cst_8 {dimension_numbers = #tpu.dot_dimension_numbers<[1], [0], [0], [1], [0, 0, 1, 1], [], []>} : vector<8x128xbf16>, vector<128x128xbf16>, vector<8x128xf32> -> vector<8x128xf32>
    %c1 = arith.constant 1 : index
    %c0_9 = arith.constant 0 : index
    %11 = vector.load %arg2[%c1, %c0_9] : memref<3x128xf32, #tpu.memory_space<vmem>>, vector<1x128xf32>
    %12 = vector.broadcast %11 : vector<1x128xf32> to vector<8x128xf32>
    %13 = arith.addf %10, %12 : vector<8x128xf32>
    %cst_10 = arith.constant 0.000000e+00 : f32
    %14 = vector.broadcast %cst_10 : f32 to vector<8x128xf32>
    %15 = arith.maximumf %13, %14 : vector<8x128xf32>
    %16 = arith.truncf %15 : vector<8x128xf32> to vector<8x128xbf16>
    %c0_11 = arith.constant 0 : index
    %c0_12 = arith.constant 0 : index
    %17 = vector.load %arg5[%c0_11, %c0_12] : memref<128x128xbf16, #tpu.memory_space<vmem>>, vector<128x128xbf16>
    %cst_13 = arith.constant dense<0.000000e+00> : vector<8x128xf32>
    %18 = tpu.matmul %16, %17, %cst_13 {dimension_numbers = #tpu.dot_dimension_numbers<[1], [0], [0], [1], [0, 0, 1, 1], [], []>} : vector<8x128xbf16>, vector<128x128xbf16>, vector<8x128xf32> -> vector<8x128xf32>
    %c2 = arith.constant 2 : index
    %c0_14 = arith.constant 0 : index
    %19 = vector.load %arg2[%c2, %c0_14] : memref<3x128xf32, #tpu.memory_space<vmem>>, vector<1x128xf32>
    %20 = vector.broadcast %19 : vector<1x128xf32> to vector<8x128xf32>
    %21 = arith.addf %18, %20 : vector<8x128xf32>
    %c0_15 = arith.constant 0 : index
    %c0_16 = arith.constant 0 : index
    %22 = vector.load %arg6[%c0_15, %c0_16] : memref<8x128xf32, #tpu.memory_space<vmem>>, vector<8x128xf32>
    tpu.vector_store %arg6[%c0_15, %c0_16], %21 {strides = array<i32>} : memref<8x128xf32, #tpu.memory_space<vmem>>, vector<8x128xf32>,
    return
  }
  func.func @transform_0(%arg0: i32) -> (i32, i32) {
    %c0_i32 = arith.constant 0 : i32
    %c0_i32_0 = arith.constant 0 : i32
    return %arg0, %c0_i32 : i32, i32
  }
  func.func @transform_1(%arg0: i32) -> (i32, i32) {
    %c0_i32 = arith.constant 0 : i32
    %c0_i32_0 = arith.constant 0 : i32
    %c0_i32_1 = arith.constant 0 : i32
    return %c0_i32, %c0_i32_0 : i32, i32
  }
  func.func @transform_2(%arg0: i32) -> (i32, i32) {
    %c0_i32 = arith.constant 0 : i32
    %c0_i32_0 = arith.constant 0 : i32
    %c0_i32_1 = arith.constant 0 : i32
    return %c0_i32, %c0_i32_0 : i32, i32
  }
  func.func @transform_3(%arg0: i32) -> (i32, i32) {
    %c0_i32 = arith.constant 0 : i32
    %c0_i32_0 = arith.constant 0 : i32
    %c0_i32_1 = arith.constant 0 : i32
    return %c0_i32, %c0_i32_0 : i32, i32
  }
  func.func @transform_4(%arg0: i32) -> (i32, i32) {
    %c0_i32 = arith.constant 0 : i32
    %c0_i32_0 = arith.constant 0 : i32
    %c0_i32_1 = arith.constant 0 : i32
    return %c0_i32, %c0_i32_0 : i32, i32
  }
  func.func @transform_5(%arg0: i32) -> (i32, i32) {
    %c0_i32 = arith.constant 0 : i32
    %c0_i32_0 = arith.constant 0 : i32
    return %arg0, %c0_i32 : i32, i32
  }
}

module attributes {stable_mosaic.version = 11 : i64} {
  func.func @kernel(%arg0: i32, %arg1: memref<8x128xbf16, #tpu.memory_space<vmem>>, %arg2: memref<3x128xf32, #tpu.memory_space<vmem>>, %arg3: memref<128x128xbf16, #tpu.memory_space<vmem>>, %arg4: memref<128x128xbf16, #tpu.memory_space<vmem>>, %arg5: memref<128x128xbf16, #tpu.memory_space<vmem>>, %arg6: memref<8x128xf32, #tpu.memory_space<vmem>>) attributes {dimension_semantics = [#tpu.dimension_semantics<parallel>], iteration_bounds = array<i64: 1>, scalar_prefetch = 0 : i64, scratch_operands = 0 : i64, tpu.core_type = #tpu.core_type<tc>, window_params = [{transform_indices = @transform_0, window_bounds = array<i64: 8, 128>}, {pipeline_mode = #tpu.pipeline_mode<synchronous>, transform_indices = @transform_1, window_bounds = array<i64: 3, 128>}, {pipeline_mode = #tpu.pipeline_mode<synchronous>, transform_indices = @transform_2, window_bounds = array<i64: 128, 128>}, {pipeline_mode = #tpu.pipeline_mode<synchronous>, transform_indices = @transform_3, window_bounds = array<i64: 128, 128>}, {pipeline_mode = #tpu.pipeline_mode<synchronous>, transform_indices = @transform_4, window_bounds = array<i64: 128, 128>}, {transform_indices = @transform_5, window_bounds = array<i64: 8, 128>}]} {
    %c0 = arith.constant 0 : index
    %c0_0 = arith.constant 0 : index
    %0 = vector.load %arg1[%c0, %c0_0] : memref<8x128xbf16, #tpu.memory_space<vmem>>, vector<8x128xbf16>
    %c0_1 = arith.constant 0 : index
    %c0_2 = arith.constant 0 : index
    %1 = vector.load %arg3[%c0_1, %c0_2] : memref<128x128xbf16, #tpu.memory_space<vmem>>, vector<128x128xbf16>
    %cst = arith.constant dense<0.000000e+00> : vector<8x128xf32>
    %2 = tpu.matmul %0, %1, %cst {dimension_numbers = #tpu.dot_dimension_numbers<[1], [0], [0], [1], [0, 0, 1, 1], [], []>} : vector<8x128xbf16>, vector<128x128xbf16>, vector<8x128xf32> -> vector<8x128xf32>
    %c0_3 = arith.constant 0 : index
    %c0_4 = arith.constant 0 : index
    %3 = vector.load %arg2[%c0_3, %c0_4] : memref<3x128xf32, #tpu.memory_space<vmem>>, vector<1x128xf32>
    %4 = vector.broadcast %3 : vector<1x128xf32> to vector<8x128xf32>
    %5 = arith.addf %2, %4 : vector<8x128xf32>
    %cst_5 = arith.constant 0.000000e+00 : f32
    %6 = vector.broadcast %cst_5 : f32 to vector<8x128xf32>
    %7 = arith.maximumf %5, %6 : vector<8x128xf32>
    %8 = arith.truncf %7 : vector<8x128xf32> to vector<8x128xbf16>
    %c0_6 = arith.constant 0 : index
    %c0_7 = arith.constant 0 : index
    %9 = vector.load %arg4[%c0_6, %c0_7] : memref<128x128xbf16, #tpu.memory_space<vmem>>, vector<128x128xbf16>
    %cst_8 = arith.constant dense<0.000000e+00> : vector<8x128xf32>
    %10 = tpu.matmul %8, %9, %cst_8 {dimension_numbers = #tpu.dot_dimension_numbers<[1], [0], [0], [1], [0, 0, 1, 1], [], []>} : vector<8x128xbf16>, vector<128x128xbf16>, vector<8x128xf32> -> vector<8x128xf32>
    %c1 = arith.constant 1 : index
    %c0_9 = arith.constant 0 : index
    %11 = vector.load %arg2[%c1, %c0_9] : memref<3x128xf32, #tpu.memory_space<vmem>>, vector<1x128xf32>
    %12 = vector.broadcast %11 : vector<1x128xf32> to vector<8x128xf32>
    %13 = arith.addf %10, %12 : vector<8x128xf32>
    %cst_10 = arith.constant 0.000000e+00 : f32
    %14 = vector.broadcast %cst_10 : f32 to vector<8x128xf32>
    %15 = arith.maximumf %13, %14 : vector<8x128xf32>
    %16 = arith.truncf %15 : vector<8x128xf32> to vector<8x128xbf16>
    %c0_11 = arith.constant 0 : index
    %c0_12 = arith.constant 0 : index
    %17 = vector.load %arg5[%c0_11, %c0_12] : memref<128x128xbf16, #tpu.memory_space<vmem>>, vector<128x128xbf16>
    %cst_13 = arith.constant dense<0.000000e+00> : vector<8x128xf32>
    %18 = tpu.matmul %16, %17, %cst_13 {dimension_numbers = #tpu.dot_dimension_numbers<[1], [0], [0], [1], [0, 0, 1, 1], [], []>} : vector<8x128xbf16>, vector<128x128xbf16>, vector<8x128xf32> -> vector<8x128xf32>
    %c2 = arith.constant 2 : index
    %c0_14 = arith.constant 0 : index
    %19 = vector.load %arg2[%c2, %c0_14] : memref<3x128xf32, #tpu.memory_space<vmem>>, vector<1x128xf32>
    %20 = vector.broadcast %19 : vector<1x128xf32> to vector<8x128xf32>
    %21 = arith.addf %18, %20 : vector<8x128xf32>
    %c0_15 = arith.constant 0 : index
    %c0_16 = arith.constant 0 : index
    %22 = vector.load %arg6[%c0_15, %c0_16] : memref<8x128xf32, #tpu.memory_space<vmem>>, vector<8x128xf32>
    tpu.vector_store %arg6[%c0_15, %c0_16], %21 {strides = array<i32>} : memref<8x128xf32, #tpu.memory_space<vmem>>, vector<8x128xf32>,
    return
  }
  func.func @transform_0(%arg0: i32) -> (i32, i32) {
    %c0_i32 = arith.constant 0 : i32
    %c0_i32_0 = arith.constant 0 : i32
    return %arg0, %c0_i32 : i32, i32
  }
  func.func @transform_1(%arg0: i32) -> (i32, i32) {
    %c0_i32 = arith.constant 0 : i32
    %c0_i32_0 = arith.constant 0 : i32
    %c0_i32_1 = arith.constant 0 : i32
    return %c0_i32, %c0_i32_0 : i32, i32
  }
  func.func @transform_2(%arg0: i32) -> (i32, i32) {
    %c0_i32 = arith.constant 0 : i32
    %c0_i32_0 = arith.constant 0 : i32
    %c0_i32_1 = arith.constant 0 : i32
    return %c0_i32, %c0_i32_0 : i32, i32
  }
  func.func @transform_3(%arg0: i32) -> (i32, i32) {
    %c0_i32 = arith.constant 0 : i32
    %c0_i32_0 = arith.constant 0 : i32
    %c0_i32_1 = arith.constant 0 : i32
    return %c0_i32, %c0_i32_0 : i32, i32
  }
  func.func @transform_4(%arg0: i32) -> (i32, i32) {
    %c0_i32 = arith.constant 0 : i32
    %c0_i32_0 = arith.constant 0 : i32
    %c0_i32_1 = arith.constant 0 : i32
    return %c0_i32, %c0_i32_0 : i32, i32
  }
  func.func @transform_5(%arg0: i32) -> (i32, i32) {
    %c0_i32 = arith.constant 0 : i32
    %c0_i32_0 = arith.constant 0 : i32
    return %arg0, %c0_i32 : i32, i32
  }
}

</mosaic_0001>

<bundles_post_ra>
// kernel: tpu_custom_call.1
= control target key start
LH: loop header
LB: loop body
LE: loop exit
PB: predicated region body
PF: predicated region fallthrough
CT: control target
= control target key end

     0   :  { %10 = vsyncpa [#allocation3], 0  ;;  %s875_s0 = inlined_call_operand.hbm [shape: bf16[8,128], index: 0, kind: input, shape index: {}]   ;;  %s876_s1 = inlined_call_operand.hbm [shape: f32[3,128], index: 1, kind: input, shape index: {}]   ;;  %s877_s2 = inlined_call_operand.hbm [shape: bf16[128,128], index: 2, kind: input, shape index: {}]   ;;  %s878_s3 = inlined_call_operand.hbm [shape: bf16[128,128], index: 3, kind: input, shape index: {}]   ;;  %s879_s4 = inlined_call_operand.hbm [shape: bf16[128,128], index: 4, kind: input, shape index: {}]   ;;  %s880_s5 = inlined_call_operand.hbm [shape: f32[8,128], index: 5, kind: output, shape index: {}]  }
   0x1   :  { %11 = vsyncpa [#allocation6], 0 }
   0x2   :  { %12 = vsyncpa [#allocation9], 0 }
   0x3   :  { %13 = vsyncpa [#allocation4], 0  ;;  %s724_s18 = smov [#allocation5]   ;;  %s584_s22 = scalar_lea.hbm %s876_s1, 64 }
   0x4   :  { %s30_s19 = sshll.u32 %s724_s18, 4  ;;  %p585_p0 = scmp.ne.s32.totalorder %s876_s1, %s584_s22  ;;  %s31_s19 = int_to_ptr.vmem [resolvable:$true] %s30_s19 }
   0x5   :  { %p588_p1 = scmp.lt.u32.totalorder %s584_s22, %s876_s1 }
   0x7   :  { %p590_p2 = pnand %p588_p1, %p585_p0 }
   0x9   :  { %593 = shalt.err (!%p590_p2)
}
   0xa   :  { %s594_s27 = scalar_lea.vmem %s31_s19, 64  ;;  %p599_p4 = scmp.lt.s32.totalorder %s31_s19, %s31_s19 }
   0xb   :  { %p595_p3 = scmp.ne.s32.totalorder %s31_s19, %s594_s27  ;;  %p600_p5 = scmp.lt.s32.totalorder %s594_s27, %s594_s27 }
   0xd   :  { %p601_p6 = por %p600_p5, %p599_p4 }
   0xf   :  { %p602_p7 = pnand %p601_p6, %p595_p3 }
  0x11   :  { %605 = shalt.err (!%p602_p7)
}
  0x12   :  { %33 = dma.hbm_to_vmem [thread:$0]  %s876_s1, 64, %s31_s19, [#allocation6]  }
  0x13   :  { %s725_s30 = smov [#allocation8]   ;;  %s726_s7 = smov [#allocation2]  }
  0x14   :  { %s51_s6 = sshll.u32 %s725_s30, 4  ;;  %s20_s8 = sshll.u32 %s726_s7, 4  ;;  %s52_s6 = int_to_ptr.vmem [resolvable:$true] %s51_s6  ;;  %s21_s8 = int_to_ptr.vmem [resolvable:$true] %s20_s8 }
  0x15   :  { %s606_s11 = scalar_lea.hbm %s878_s3, 1024 }
  0x16   :  { %p607_p8 = scmp.ne.s32.totalorder %s878_s3, %s606_s11  ;;  %p610_p9 = scmp.lt.u32.totalorder %s606_s11, %s878_s3 }
  0x18   :  { %p612_p10 = pnand %p610_p9, %p607_p8 }
  0x1a   :  { %615 = shalt.err (!%p612_p10)
}
  0x1b   :  { %s616_s1 = scalar_lea.vmem %s52_s6, 1024  ;;  %p621_p12 = scmp.lt.s32.totalorder %s52_s6, %s52_s6 }
  0x1c   :  { %p617_p11 = scmp.ne.s32.totalorder %s52_s6, %s616_s1  ;;  %p622_p13 = scmp.lt.s32.totalorder %s616_s1, %s616_s1 }
  0x1e   :  { %p623_p0 = por %p622_p13, %p621_p12 }
  0x20   :  { %p624_p1 = pnand %p623_p0, %p617_p11 }
  0x22   :  { %627 = shalt.err (!%p624_p1)
}
  0x23   :  { %s727_s16 = smov 64   ;;  %s728_s17 = smov 4  }
  0x24   :  { %57 = dma.hbm_to_vmem [thread:$0]  %s878_s3, 1024, %s52_s6, [#allocation9], %s727_s16, %s727_s16, %s728_s17  }
  0x25   :  { %s628_s22 = scalar_lea.hbm %s875_s0, 64 }
  0x26   :  { %p629_p2 = scmp.ne.s32.totalorder %s875_s0, %s628_s22  ;;  %p632_p3 = scmp.lt.u32.totalorder %s628_s22, %s875_s0 }
  0x28   :  { %p634_p4 = pnand %p632_p3, %p629_p2 }
  0x2a   :  { %637 = shalt.err (!%p634_p4)
}
  0x2b   :  { %s638_s27 = scalar_lea.vmem %s21_s8, 64  ;;  %p643_p6 = scmp.lt.s32.totalorder %s21_s8, %s21_s8 }
  0x2c   :  { %p639_p5 = scmp.ne.s32.totalorder %s21_s8, %s638_s27  ;;  %p644_p7 = scmp.lt.s32.totalorder %s638_s27, %s638_s27 }
  0x2e   :  { %p645_p8 = por %p644_p7, %p643_p6 }
  0x30   :  { %p646_p9 = pnand %p645_p8, %p639_p5 }
  0x32   :  { %649 = shalt.err (!%p646_p9)
}
  0x33   :  { %23 = dma.hbm_to_vmem [thread:$0]  %s875_s0, 64, %s21_s8, [#allocation3]  }
  0x34   :  { %s729_s29 = smov [#allocation7]   ;;  %s730_s6 = smov [#allocation10]  }
  0x35   :  { %s39_s30 = sshll.u32 %s729_s29, 4  ;;  %s63_s7 = sshll.u32 %s730_s6, 4  ;;  %s40_s30 = int_to_ptr.vmem [resolvable:$true] %s39_s30  ;;  %s64_s7 = int_to_ptr.vmem [resolvable:$true] %s63_s7 }
  0x36   :  { %s650_s11 = scalar_lea.hbm %s877_s2, 1024 }
  0x37   :  { %p651_p10 = scmp.ne.s32.totalorder %s877_s2, %s650_s11  ;;  %p654_p11 = scmp.lt.u32.totalorder %s650_s11, %s877_s2 }
  0x39   :  { %p656_p12 = pnand %p654_p11, %p651_p10 }
  0x3b   :  { %659 = shalt.err (!%p656_p12)
}
  0x3c   :  { %s660_s0 = scalar_lea.vmem %s40_s30, 1024  ;;  %p665_p0 = scmp.lt.s32.totalorder %s40_s30, %s40_s30 }
  0x3d   :  { %p661_p13 = scmp.ne.s32.totalorder %s40_s30, %s660_s0  ;;  %p666_p1 = scmp.lt.s32.totalorder %s660_s0, %s660_s0 }
  0x3f   :  { %p667_p2 = por %p666_p1, %p665_p0 }
  0x41   :  { %p668_p3 = pnand %p667_p2, %p661_p13 }
  0x43   :  { %671 = shalt.err (!%p668_p3)
}
  0x44   :  { %45 = dma.hbm_to_vmem [thread:$0]  %s877_s2, 1024, %s40_s30, [#allocation6], %s727_s16, %s727_s16, %s728_s17  }
  0x45   :  { %s672_s20 = scalar_lea.hbm %s879_s4, 1024 }
  0x46   :  { %p673_p4 = scmp.ne.s32.totalorder %s879_s4, %s672_s20  ;;  %p676_p5 = scmp.lt.u32.totalorder %s672_s20, %s879_s4 }
  0x48   :  { %p678_p6 = pnand %p676_p5, %p673_p4 }
  0x4a   :  { %681 = shalt.err (!%p678_p6)
}
  0x4b   :  { %s682_s25 = scalar_lea.vmem %s64_s7, 1024  ;;  %p687_p8 = scmp.lt.s32.totalorder %s64_s7, %s64_s7 }
  0x4c   :  { %p683_p7 = scmp.ne.s32.totalorder %s64_s7, %s682_s25  ;;  %p688_p9 = scmp.lt.s32.totalorder %s682_s25, %s682_s25 }
  0x4e   :  { %p689_p10 = por %p688_p9, %p687_p8 }
  0x50   :  { %p690_p11 = pnand %p689_p10, %p683_p7 }
  0x52   :  { %693 = shalt.err (!%p690_p11)
}
  0x53   :  { %69 = dma.hbm_to_vmem [thread:$0]  %s879_s4, 1024, %s64_s7, [#allocation9], %s727_s16, %s727_s16, %s728_s17  }
  0x54   :  { %716 = dma.done.wait [#allocation3], 64  }
  0x55   :  { %717 = vsyncadd [#allocation3], 4294967232 }
  0x56   :  { %718 = dma.done.wait [#allocation6], 1088  }
  0x57   :  { %719 = vsyncadd [#allocation6], 4294966208 }
  0x58   :  { %720 = dma.done.wait [#allocation9], 2048  }
  0x59   :  { %721 = vsyncadd [#allocation9], 4294965248  ;;  %v731_v0 = vmov 0.0   ;;  %vm732_vm0 = vmmov 0   ;;  %v560_v1 = vld [vmem:[#allocation7] sm:$0xff]   ;;  %v561_v2 = vld [vmem:[#allocation7 + $0x8] sm:$0xff]  }
  0x5a   :  { %490 = vmatprep.subr.bf16.mxu0 %v731_v0  ;;  %506 = vmatprep.mubr.msk.bf16.mxu0 %vm732_vm0, %v731_v0  ;;  %v562_v3 = vld [vmem:[#allocation7 + $0x10] sm:$0xff]   ;;  %v568_v4 = vld [vmem:[#allocation8] sm:$0xff]   ;;  %v563_v5 = vld [vmem:[#allocation7 + $0x18] sm:$0xff]   ;;  %s733_s4 = smov [#allocation11]  }
  0x5b   :  { %510 = vmatprep.subr.bf16.mxu1 %v731_v0  ;;  %526 = vmatprep.mubr.msk.bf16.mxu1 %vm732_vm0, %v731_v0  ;;  %v569_v6 = vld [vmem:[#allocation8 + $0x8] sm:$0xff]   ;;  %v564_v7 = vld [vmem:[#allocation7 + $0x20] sm:$0xff]   ;;  %v570_v8 = vld [vmem:[#allocation8 + $0x10] sm:$0xff]   ;;  %s425_s16 = sshll.u32 %s733_s4, 4  ;;  %s426_s16 = int_to_ptr.vmem [resolvable:$true] %s425_s16 }
  0x5c   :  { %491 = vmatpush3.bf16.msra.mxu0 %v560_v1  ;;  %511 = vmatpush3.bf16.msra.mxu1 %v568_v4  ;;  %v565_v9 = vld [vmem:[#allocation7 + $0x28] sm:$0xff]   ;;  %v571_v10 = vld [vmem:[#allocation8 + $0x18] sm:$0xff]   ;;  %v566_v11 = vld [vmem:[#allocation7 + $0x30] sm:$0xff]   ;;  %s694_s17 = scalar_lea.vmem %s426_s16, 128  ;;  %p699_p13 = scmp.lt.s32.totalorder %s426_s16, %s426_s16 }
  0x5d   :  { %492 = vmatprep.subr.bf16.mxu0 %v731_v0  ;;  %512 = vmatprep.subr.bf16.mxu1 %v731_v0  ;;  %v572_v12 = vld [vmem:[#allocation8 + $0x20] sm:$0xff]   ;;  %v567_v13 = vld [vmem:[#allocation7 + $0x38] sm:$0xff]   ;;  %v573_v14 = vld [vmem:[#allocation8 + $0x28] sm:$0xff]   ;;  %p695_p12 = scmp.ne.s32.totalorder %s426_s16, %s694_s17  ;;  %p700_p0 = scmp.lt.s32.totalorder %s694_s17, %s694_s17 }
  0x5e   :  { %v86_v15 = vld [vmem:[#allocation2] sm:$0xf]  ;;  %v574_v16 = vld [vmem:[#allocation8 + $0x30] sm:$0xff]   ;;  %v576_v18 = vld [vmem:[#allocation10] sm:$0xff]  }
  0x5f   :  { %v575_v17 = vld [vmem:[#allocation8 + $0x38] sm:$0xff]   ;;  %v577_v19 = vld [vmem:[#allocation10 + $0x8] sm:$0xff]   ;;  %v578_v20 = vld [vmem:[#allocation10 + $0x10] sm:$0xff]   ;;  %p701_p1 = por %p700_p0, %p699_p13 }
  0x60   :  { %493 = vmatpush3.bf16.msra.mxu0 %v561_v2  ;;  %513 = vmatpush3.bf16.msra.mxu1 %v569_v6  ;;  %v579_v21 = vld [vmem:[#allocation10 + $0x18] sm:$0xff]   ;;  %v580_v22 = vld [vmem:[#allocation10 + $0x20] sm:$0xff]   ;;  %v581_v23 = vld [vmem:[#allocation10 + $0x28] sm:$0xff]  }
  0x61   :  { %494 = vmatprep.subr.bf16.mxu0 %v731_v0  ;;  %514 = vmatprep.subr.bf16.mxu1 %v731_v0  ;;  %v436_v24 = vld [vmem:[#allocation5] ss:$0 sm:$0xff]  ;;  %v582_v32 = vld [vmem:[#allocation10 + $0x30] sm:$0xff]   ;;  %v445_v34 = vld [vmem:[#allocation5 + $0x1] ss:$0 sm:$0xff]  ;;  %p702_p2 = pnand %p701_p1, %p695_p12 }
  0x62   :  { %v583_v33 = vld [vmem:[#allocation10 + $0x38] sm:$0xff]  }
  0x63   :  { %v454_v42 = vld [vmem:[#allocation5 + $0x2] ss:$0 sm:$0xff] }
  0x64   :  { %495 = vmatpush3.bf16.msra.mxu0 %v562_v3  ;;  %515 = vmatpush3.bf16.msra.mxu1 %v570_v8 }
  0x65   :  { %496 = vmatprep.subr.bf16.mxu0 %v731_v0  ;;  %516 = vmatprep.subr.bf16.mxu1 %v731_v0 }
  0x68   :  { %497 = vmatpush3.bf16.msra.mxu0 %v563_v5  ;;  %517 = vmatpush3.bf16.msra.mxu1 %v571_v10 }
  0x69   :  { %498 = vmatprep.subr.bf16.mxu0 %v731_v0  ;;  %518 = vmatprep.subr.bf16.mxu1 %v731_v0 }
  0x6c   :  { %499 = vmatpush3.bf16.msra.mxu0 %v564_v7  ;;  %519 = vmatpush3.bf16.msra.mxu1 %v572_v12 }
  0x6d   :  { %500 = vmatprep.subr.bf16.mxu0 %v731_v0  ;;  %520 = vmatprep.subr.bf16.mxu1 %v731_v0 }
  0x70   :  { %501 = vmatpush3.bf16.msra.mxu0 %v565_v9  ;;  %521 = vmatpush3.bf16.msra.mxu1 %v573_v14 }
  0x71   :  { %502 = vmatprep.subr.bf16.mxu0 %v731_v0  ;;  %522 = vmatprep.subr.bf16.mxu1 %v731_v0 }
  0x74   :  { %503 = vmatpush3.bf16.msra.mxu0 %v566_v11  ;;  %523 = vmatpush3.bf16.msra.mxu1 %v574_v16 }
  0x75   :  { %504 = vmatprep.subr.bf16.mxu0 %v731_v0  ;;  %524 = vmatprep.subr.bf16.mxu1 %v731_v0 }
  0x78   :  { %505 = vmatpush3.bf16.msra.mxu0 %v567_v13  ;;  %525 = vmatpush3.bf16.msra.mxu1 %v575_v17 }
  0x79   :  { %530 = vmatprep.subr.bf16.mxu0 %v731_v0 }
  0x7b   :  { %507 = vmatmul.mubr.bf16.vlgmr.msra.gmra.mrb[0].mxu0 %v86_v15 }
  0x7c   :  { %546 = vmatprep.mubr.msk.bf16.mxu0 %vm732_vm0, %v731_v0  ;;  %531 = vmatpush3.bf16.msra.mxu0 %v576_v18 }
  0x7d   :  { %532 = vmatprep.subr.bf16.mxu0 %v731_v0 }
  0x80   :  { %533 = vmatpush3.bf16.msra.mxu0 %v577_v19 }
  0x81   :  { %534 = vmatprep.subr.bf16.mxu0 %v731_v0 }
  0x84   :  { %535 = vmatpush3.bf16.msra.mxu0 %v578_v20 }
  0x85   :  { %536 = vmatprep.subr.bf16.mxu0 %v731_v0 }
  0x88   :  { %537 = vmatpush3.bf16.msra.mxu0 %v579_v21 }
  0x89   :  { %538 = vmatprep.subr.bf16.mxu0 %v731_v0 }
  0x8c   :  { %539 = vmatpush3.bf16.msra.mxu0 %v580_v22 }
  0x8d   :  { %540 = vmatprep.subr.bf16.mxu0 %v731_v0 }
  0x90   :  { %541 = vmatpush3.bf16.msra.mxu0 %v581_v23 }
  0x91   :  { %542 = vmatprep.subr.bf16.mxu0 %v731_v0 }
  0x94   :  { %543 = vmatpush3.bf16.msra.mxu0 %v582_v32 }
  0x95   :  { %544 = vmatprep.subr.bf16.mxu0 %v731_v0 }
  0x98   :  { %545 = vmatpush3.bf16.msra.mxu0 %v583_v33 }
 0x14e   :  { %v190_v25 = vpop.f32.mrb[0].mxu0 }
 0x14f   :  { %v191_v26 = vadd.f32 %v436_v24, %v190_v25  ;;  %v508_v27 = vpop.f32.mrb[1].mxu0 }
 0x150   :  { %v193_v28 = vpop.f32.mrb[2].mxu0 }
 0x151   :  { %v196_v29 = vmax.f32 %v191_v26, 0.0  ;;  %v509_v30 = vpop.f32.mrb[3].mxu0 }
 0x153   :  { %v197_v31 = vpack.c.bf16 %v196_v29, %v196_v29 }
 0x155   :  { %527 = vmatmul.mubr.bf16.vlgmr.msra.gmra.mrb[0].mxu1 %v197_v31 }
 0x228   :  { %v301_v35 = vpop.f32.mrb[0].mxu1 }
 0x229   :  { %v302_v36 = vadd.f32 %v445_v34, %v301_v35  ;;  %v528_v37 = vpop.f32.mrb[1].mxu1 }
 0x22a   :  { %v304_v38 = vpop.f32.mrb[2].mxu1 }
 0x22b   :  { %v307_v39 = vmax.f32 %v302_v36, 0.0  ;;  %v529_v40 = vpop.f32.mrb[3].mxu1 }
 0x22d   :  { %v308_v41 = vpack.c.bf16 %v307_v39, %v307_v39 }
 0x22f   :  { %547 = vmatmul.mubr.bf16.vlgmr.msra.gmra.mrb[4].mxu0 %v308_v41 }
 0x302   :  { %v412_v43 = vpop.f32.mrb[4].mxu0 }
 0x303   :  { %v413_v44 = vadd.f32 %v454_v42, %v412_v43  ;;  %v548_v45 = vpop.f32.mrb[5].mxu0 }
 0x304   :  { %v415_v46 = vpop.f32.mrb[6].mxu0 }
 0x305   :  { %418 = vst [vmem:[#allocation11] sm:$0xff] %v413_v44  ;;  %v549_v47 = vpop.f32.mrb[7].mxu0 }
 0x306   :  { %705 = shalt.err (!%p702_p2)
}
 0x307   :  { %s706_s28 = scalar_lea.hbm %s880_s5, 128 }
 0x308   :  { %p707_p3 = scmp.ne.s32.totalorder %s880_s5, %s706_s28  ;;  %p710_p4 = scmp.lt.u32.totalorder %s706_s28, %s880_s5 }
 0x30a   :  { %p712_p5 = pnand %p710_p4, %p707_p3 }
 0x30c   :  { %715 = shalt.err (!%p712_p5)
}
 0x30d   :  { %428 = dma.vmem_to_hbm [thread:$0]  %s426_s16, 128, %s880_s5, [#allocation4]  }
 0x30e   :  { %722 = dma.done.wait [#allocation4], 128  }
 0x30f   :  { %723 = vsyncadd [#allocation4], 4294967168 }
 0x310   :  { %432 = vsyncpa [#allocation3], 1 }
 0x311   :  { %433 = vsyncpa [#allocation6], 1 }
 0x312   :  { %434 = vsyncpa [#allocation9], 1 }
 0x313   :  { %435 = vsyncpa [#allocation4], 1 }

// kernel: tpu_custom_call.1
= control target key start
LH: loop header
LB: loop body
LE: loop exit
PB: predicated region body
PF: predicated region fallthrough
CT: control target
= control target key end

     0   :  { %10 = vsyncpa [#allocation3], 0  ;;  %s875_s0 = inlined_call_operand.hbm [shape: bf16[8,128], index: 0, kind: input, shape index: {}]   ;;  %s876_s1 = inlined_call_operand.hbm [shape: f32[3,128], index: 1, kind: input, shape index: {}]   ;;  %s877_s2 = inlined_call_operand.hbm [shape: bf16[128,128], index: 2, kind: input, shape index: {}]   ;;  %s878_s3 = inlined_call_operand.hbm [shape: bf16[128,128], index: 3, kind: input, shape index: {}]   ;;  %s879_s4 = inlined_call_operand.hbm [shape: bf16[128,128], index: 4, kind: input, shape index: {}]   ;;  %s880_s5 = inlined_call_operand.hbm [shape: f32[8,128], index: 5, kind: output, shape index: {}]  }
   0x1   :  { %11 = vsyncpa [#allocation6], 0 }
   0x2   :  { %12 = vsyncpa [#allocation9], 0 }
   0x3   :  { %13 = vsyncpa [#allocation4], 0  ;;  %s724_s18 = smov [#allocation5]   ;;  %s584_s22 = scalar_lea.hbm %s876_s1, 64 }
   0x4   :  { %s30_s19 = sshll.u32 %s724_s18, 4  ;;  %p585_p0 = scmp.ne.s32.totalorder %s876_s1, %s584_s22  ;;  %s31_s19 = int_to_ptr.vmem [resolvable:$true] %s30_s19 }
   0x5   :  { %p588_p1 = scmp.lt.u32.totalorder %s584_s22, %s876_s1 }
   0x7   :  { %p590_p2 = pnand %p588_p1, %p585_p0 }
   0x9   :  { %593 = shalt.err (!%p590_p2)
}
   0xa   :  { %s594_s27 = scalar_lea.vmem %s31_s19, 64  ;;  %p599_p4 = scmp.lt.s32.totalorder %s31_s19, %s31_s19 }
   0xb   :  { %p595_p3 = scmp.ne.s32.totalorder %s31_s19, %s594_s27  ;;  %p600_p5 = scmp.lt.s32.totalorder %s594_s27, %s594_s27 }
   0xd   :  { %p601_p6 = por %p600_p5, %p599_p4 }
   0xf   :  { %p602_p7 = pnand %p601_p6, %p595_p3 }
  0x11   :  { %605 = shalt.err (!%p602_p7)
}
  0x12   :  { %33 = dma.hbm_to_vmem [thread:$0]  %s876_s1, 64, %s31_s19, [#allocation6]  }
  0x13   :  { %s725_s30 = smov [#allocation8]   ;;  %s726_s7 = smov [#allocation2]  }
  0x14   :  { %s51_s6 = sshll.u32 %s725_s30, 4  ;;  %s20_s8 = sshll.u32 %s726_s7, 4  ;;  %s52_s6 = int_to_ptr.vmem [resolvable:$true] %s51_s6  ;;  %s21_s8 = int_to_ptr.vmem [resolvable:$true] %s20_s8 }
  0x15   :  { %s606_s11 = scalar_lea.hbm %s878_s3, 1024 }
  0x16   :  { %p607_p8 = scmp.ne.s32.totalorder %s878_s3, %s606_s11  ;;  %p610_p9 = scmp.lt.u32.totalorder %s606_s11, %s878_s3 }
  0x18   :  { %p612_p10 = pnand %p610_p9, %p607_p8 }
  0x1a   :  { %615 = shalt.err (!%p612_p10)
}
  0x1b   :  { %s616_s1 = scalar_lea.vmem %s52_s6, 1024  ;;  %p621_p12 = scmp.lt.s32.totalorder %s52_s6, %s52_s6 }
  0x1c   :  { %p617_p11 = scmp.ne.s32.totalorder %s52_s6, %s616_s1  ;;  %p622_p13 = scmp.lt.s32.totalorder %s616_s1, %s616_s1 }
  0x1e   :  { %p623_p0 = por %p622_p13, %p621_p12 }
  0x20   :  { %p624_p1 = pnand %p623_p0, %p617_p11 }
  0x22   :  { %627 = shalt.err (!%p624_p1)
}
  0x23   :  { %s727_s16 = smov 64   ;;  %s728_s17 = smov 4  }
  0x24   :  { %57 = dma.hbm_to_vmem [thread:$0]  %s878_s3, 1024, %s52_s6, [#allocation9], %s727_s16, %s727_s16, %s728_s17  }
  0x25   :  { %s628_s22 = scalar_lea.hbm %s875_s0, 64 }
  0x26   :  { %p629_p2 = scmp.ne.s32.totalorder %s875_s0, %s628_s22  ;;  %p632_p3 = scmp.lt.u32.totalorder %s628_s22, %s875_s0 }
  0x28   :  { %p634_p4 = pnand %p632_p3, %p629_p2 }
  0x2a   :  { %637 = shalt.err (!%p634_p4)
}
  0x2b   :  { %s638_s27 = scalar_lea.vmem %s21_s8, 64  ;;  %p643_p6 = scmp.lt.s32.totalorder %s21_s8, %s21_s8 }
  0x2c   :  { %p639_p5 = scmp.ne.s32.totalorder %s21_s8, %s638_s27  ;;  %p644_p7 = scmp.lt.s32.totalorder %s638_s27, %s638_s27 }
  0x2e   :  { %p645_p8 = por %p644_p7, %p643_p6 }
  0x30   :  { %p646_p9 = pnand %p645_p8, %p639_p5 }
  0x32   :  { %649 = shalt.err (!%p646_p9)
}
  0x33   :  { %23 = dma.hbm_to_vmem [thread:$0]  %s875_s0, 64, %s21_s8, [#allocation3]  }
  0x34   :  { %s729_s29 = smov [#allocation7]   ;;  %s730_s6 = smov [#allocation10]  }
  0x35   :  { %s39_s30 = sshll.u32 %s729_s29, 4  ;;  %s63_s7 = sshll.u32 %s730_s6, 4  ;;  %s40_s30 = int_to_ptr.vmem [resolvable:$true] %s39_s30  ;;  %s64_s7 = int_to_ptr.vmem [resolvable:$true] %s63_s7 }
  0x36   :  { %s650_s11 = scalar_lea.hbm %s877_s2, 1024 }
  0x37   :  { %p651_p10 = scmp.ne.s32.totalorder %s877_s2, %s650_s11  ;;  %p654_p11 = scmp.lt.u32.totalorder %s650_s11, %s877_s2 }
  0x39   :  { %p656_p12 = pnand %p654_p11, %p651_p10 }
  0x3b   :  { %659 = shalt.err (!%p656_p12)
}
  0x3c   :  { %s660_s0 = scalar_lea.vmem %s40_s30, 1024  ;;  %p665_p0 = scmp.lt.s32.totalorder %s40_s30, %s40_s30 }
  0x3d   :  { %p661_p13 = scmp.ne.s32.totalorder %s40_s30, %s660_s0  ;;  %p666_p1 = scmp.lt.s32.totalorder %s660_s0, %s660_s0 }
  0x3f   :  { %p667_p2 = por %p666_p1, %p665_p0 }
  0x41   :  { %p668_p3 = pnand %p667_p2, %p661_p13 }
  0x43   :  { %671 = shalt.err (!%p668_p3)
}
  0x44   :  { %45 = dma.hbm_to_vmem [thread:$0]  %s877_s2, 1024, %s40_s30, [#allocation6], %s727_s16, %s727_s16, %s728_s17  }
  0x45   :  { %s672_s20 = scalar_lea.hbm %s879_s4, 1024 }
  0x46   :  { %p673_p4 = scmp.ne.s32.totalorder %s879_s4, %s672_s20  ;;  %p676_p5 = scmp.lt.u32.totalorder %s672_s20, %s879_s4 }
  0x48   :  { %p678_p6 = pnand %p676_p5, %p673_p4 }
  0x4a   :  { %681 = shalt.err (!%p678_p6)
}
  0x4b   :  { %s682_s25 = scalar_lea.vmem %s64_s7, 1024  ;;  %p687_p8 = scmp.lt.s32.totalorder %s64_s7, %s64_s7 }
  0x4c   :  { %p683_p7 = scmp.ne.s32.totalorder %s64_s7, %s682_s25  ;;  %p688_p9 = scmp.lt.s32.totalorder %s682_s25, %s682_s25 }
  0x4e   :  { %p689_p10 = por %p688_p9, %p687_p8 }
  0x50   :  { %p690_p11 = pnand %p689_p10, %p683_p7 }
  0x52   :  { %693 = shalt.err (!%p690_p11)
}
  0x53   :  { %69 = dma.hbm_to_vmem [thread:$0]  %s879_s4, 1024, %s64_s7, [#allocation9], %s727_s16, %s727_s16, %s728_s17  }
  0x54   :  { %716 = dma.done.wait [#allocation3], 64  }
  0x55   :  { %717 = vsyncadd [#allocation3], 4294967232 }
  0x56   :  { %718 = dma.done.wait [#allocation6], 1088  }
  0x57   :  { %719 = vsyncadd [#allocation6], 4294966208 }
  0x58   :  { %720 = dma.done.wait [#allocation9], 2048  }
  0x59   :  { %721 = vsyncadd [#allocation9], 4294965248  ;;  %v731_v0 = vmov 0.0   ;;  %vm732_vm0 = vmmov 0   ;;  %v560_v1 = vld [vmem:[#allocation7] sm:$0xff]   ;;  %v561_v2 = vld [vmem:[#allocation7 + $0x8] sm:$0xff]  }
  0x5a   :  { %490 = vmatprep.subr.bf16.mxu0 %v731_v0  ;;  %506 = vmatprep.mubr.msk.bf16.mxu0 %vm732_vm0, %v731_v0  ;;  %v562_v3 = vld [vmem:[#allocation7 + $0x10] sm:$0xff]   ;;  %v568_v4 = vld [vmem:[#allocation8] sm:$0xff]   ;;  %v563_v5 = vld [vmem:[#allocation7 + $0x18] sm:$0xff]   ;;  %s733_s4 = smov [#allocation11]  }
  0x5b   :  { %510 = vmatprep.subr.bf16.mxu1 %v731_v0  ;;  %526 = vmatprep.mubr.msk.bf16.mxu1 %vm732_vm0, %v731_v0  ;;  %v569_v6 = vld [vmem:[#allocation8 + $0x8] sm:$0xff]   ;;  %v564_v7 = vld [vmem:[#allocation7 + $0x20] sm:$0xff]   ;;  %v570_v8 = vld [vmem:[#allocation8 + $0x10] sm:$0xff]   ;;  %s425_s16 = sshll.u32 %s733_s4, 4  ;;  %s426_s16 = int_to_ptr.vmem [resolvable:$true] %s425_s16 }
  0x5c   :  { %491 = vmatpush3.bf16.msra.mxu0 %v560_v1  ;;  %511 = vmatpush3.bf16.msra.mxu1 %v568_v4  ;;  %v565_v9 = vld [vmem:[#allocation7 + $0x28] sm:$0xff]   ;;  %v571_v10 = vld [vmem:[#allocation8 + $0x18] sm:$0xff]   ;;  %v566_v11 = vld [vmem:[#allocation7 + $0x30] sm:$0xff]   ;;  %s694_s17 = scalar_lea.vmem %s426_s16, 128  ;;  %p699_p13 = scmp.lt.s32.totalorder %s426_s16, %s426_s16 }
  0x5d   :  { %492 = vmatprep.subr.bf16.mxu0 %v731_v0  ;;  %512 = vmatprep.subr.bf16.mxu1 %v731_v0  ;;  %v572_v12 = vld [vmem:[#allocation8 + $0x20] sm:$0xff]   ;;  %v567_v13 = vld [vmem:[#allocation7 + $0x38] sm:$0xff]   ;;  %v573_v14 = vld [vmem:[#allocation8 + $0x28] sm:$0xff]   ;;  %p695_p12 = scmp.ne.s32.totalorder %s426_s16, %s694_s17  ;;  %p700_p0 = scmp.lt.s32.totalorder %s694_s17, %s694_s17 }
  0x5e   :  { %v86_v15 = vld [vmem:[#allocation2] sm:$0xf]  ;;  %v574_v16 = vld [vmem:[#allocation8 + $0x30] sm:$0xff]   ;;  %v576_v18 = vld [vmem:[#allocation10] sm:$0xff]  }
  0x5f   :  { %v575_v17 = vld [vmem:[#allocation8 + $0x38] sm:$0xff]   ;;  %v577_v19 = vld [vmem:[#allocation10 + $0x8] sm:$0xff]   ;;  %v578_v20 = vld [vmem:[#allocation10 + $0x10] sm:$0xff]   ;;  %p701_p1 = por %p700_p0, %p699_p13 }
  0x60   :  { %493 = vmatpush3.bf16.msra.mxu0 %v561_v2  ;;  %513 = vmatpush3.bf16.msra.mxu1 %v569_v6  ;;  %v579_v21 = vld [vmem:[#allocation10 + $0x18] sm:$0xff]   ;;  %v580_v22 = vld [vmem:[#allocation10 + $0x20] sm:$0xff]   ;;  %v581_v23 = vld [vmem:[#allocation10 + $0x28] sm:$0xff]  }
  0x61   :  { %494 = vmatprep.subr.bf16.mxu0 %v731_v0  ;;  %514 = vmatprep.subr.bf16.mxu1 %v731_v0  ;;  %v436_v24 = vld [vmem:[#allocation5] ss:$0 sm:$0xff]  ;;  %v582_v32 = vld [vmem:[#allocation10 + $0x30] sm:$0xff]   ;;  %v445_v34 = vld [vmem:[#allocation5 + $0x1] ss:$0 sm:$0xff]  ;;  %p702_p2 = pnand %p701_p1, %p695_p12 }
  0x62   :  { %v583_v33 = vld [vmem:[#allocation10 + $0x38] sm:$0xff]  }
  0x63   :  { %v454_v42 = vld [vmem:[#allocation5 + $0x2] ss:$0 sm:$0xff] }
  0x64   :  { %495 = vmatpush3.bf16.msra.mxu0 %v562_v3  ;;  %515 = vmatpush3.bf16.msra.mxu1 %v570_v8 }
  0x65   :  { %496 = vmatprep.subr.bf16.mxu0 %v731_v0  ;;  %516 = vmatprep.subr.bf16.mxu1 %v731_v0 }
  0x68   :  { %497 = vmatpush3.bf16.msra.mxu0 %v563_v5  ;;  %517 = vmatpush3.bf16.msra.mxu1 %v571_v10 }
  0x69   :  { %498 = vmatprep.subr.bf16.mxu0 %v731_v0  ;;  %518 = vmatprep.subr.bf16.mxu1 %v731_v0 }
  0x6c   :  { %499 = vmatpush3.bf16.msra.mxu0 %v564_v7  ;;  %519 = vmatpush3.bf16.msra.mxu1 %v572_v12 }
  0x6d   :  { %500 = vmatprep.subr.bf16.mxu0 %v731_v0  ;;  %520 = vmatprep.subr.bf16.mxu1 %v731_v0 }
  0x70   :  { %501 = vmatpush3.bf16.msra.mxu0 %v565_v9  ;;  %521 = vmatpush3.bf16.msra.mxu1 %v573_v14 }
  0x71   :  { %502 = vmatprep.subr.bf16.mxu0 %v731_v0  ;;  %522 = vmatprep.subr.bf16.mxu1 %v731_v0 }
  0x74   :  { %503 = vmatpush3.bf16.msra.mxu0 %v566_v11  ;;  %523 = vmatpush3.bf16.msra.mxu1 %v574_v16 }
  0x75   :  { %504 = vmatprep.subr.bf16.mxu0 %v731_v0  ;;  %524 = vmatprep.subr.bf16.mxu1 %v731_v0 }
  0x78   :  { %505 = vmatpush3.bf16.msra.mxu0 %v567_v13  ;;  %525 = vmatpush3.bf16.msra.mxu1 %v575_v17 }
  0x79   :  { %530 = vmatprep.subr.bf16.mxu0 %v731_v0 }
  0x7b   :  { %507 = vmatmul.mubr.bf16.vlgmr.msra.gmra.mrb[0].mxu0 %v86_v15 }
  0x7c   :  { %546 = vmatprep.mubr.msk.bf16.mxu0 %vm732_vm0, %v731_v0  ;;  %531 = vmatpush3.bf16.msra.mxu0 %v576_v18 }
  0x7d   :  { %532 = vmatprep.subr.bf16.mxu0 %v731_v0 }
  0x80   :  { %533 = vmatpush3.bf16.msra.mxu0 %v577_v19 }
  0x81   :  { %534 = vmatprep.subr.bf16.mxu0 %v731_v0 }
  0x84   :  { %535 = vmatpush3.bf16.msra.mxu0 %v578_v20 }
  0x85   :  { %536 = vmatprep.subr.bf16.mxu0 %v731_v0 }
  0x88   :  { %537 = vmatpush3.bf16.msra.mxu0 %v579_v21 }
  0x89   :  { %538 = vmatprep.subr.bf16.mxu0 %v731_v0 }
  0x8c   :  { %539 = vmatpush3.bf16.msra.mxu0 %v580_v22 }
  0x8d   :  { %540 = vmatprep.subr.bf16.mxu0 %v731_v0 }
  0x90   :  { %541 = vmatpush3.bf16.msra.mxu0 %v581_v23 }
  0x91   :  { %542 = vmatprep.subr.bf16.mxu0 %v731_v0 }
  0x94   :  { %543 = vmatpush3.bf16.msra.mxu0 %v582_v32 }
  0x95   :  { %544 = vmatprep.subr.bf16.mxu0 %v731_v0 }
  0x98   :  { %545 = vmatpush3.bf16.msra.mxu0 %v583_v33 }
 0x14e   :  { %v190_v25 = vpop.f32.mrb[0].mxu0 }
 0x14f   :  { %v191_v26 = vadd.f32 %v436_v24, %v190_v25  ;;  %v508_v27 = vpop.f32.mrb[1].mxu0 }
 0x150   :  { %v193_v28 = vpop.f32.mrb[2].mxu0 }
 0x151   :  { %v196_v29 = vmax.f32 %v191_v26, 0.0  ;;  %v509_v30 = vpop.f32.mrb[3].mxu0 }
 0x153   :  { %v197_v31 = vpack.c.bf16 %v196_v29, %v196_v29 }
 0x155   :  { %527 = vmatmul.mubr.bf16.vlgmr.msra.gmra.mrb[0].mxu1 %v197_v31 }
 0x228   :  { %v301_v35 = vpop.f32.mrb[0].mxu1 }
 0x229   :  { %v302_v36 = vadd.f32 %v445_v34, %v301_v35  ;;  %v528_v37 = vpop.f32.mrb[1].mxu1 }
 0x22a   :  { %v304_v38 = vpop.f32.mrb[2].mxu1 }
 0x22b   :  { %v307_v39 = vmax.f32 %v302_v36, 0.0  ;;  %v529_v40 = vpop.f32.mrb[3].mxu1 }
 0x22d   :  { %v308_v41 = vpack.c.bf16 %v307_v39, %v307_v39 }
 0x22f   :  { %547 = vmatmul.mubr.bf16.vlgmr.msra.gmra.mrb[4].mxu0 %v308_v41 }
 0x302   :  { %v412_v43 = vpop.f32.mrb[4].mxu0 }
 0x303   :  { %v413_v44 = vadd.f32 %v454_v42, %v412_v43  ;;  %v548_v45 = vpop.f32.mrb[5].mxu0 }
 0x304   :  { %v415_v46 = vpop.f32.mrb[6].mxu0 }
 0x305   :  { %418 = vst [vmem:[#allocation11] sm:$0xff] %v413_v44  ;;  %v549_v47 = vpop.f32.mrb[7].mxu0 }
 0x306   :  { %705 = shalt.err (!%p702_p2)
}
 0x307   :  { %s706_s28 = scalar_lea.hbm %s880_s5, 128 }
 0x308   :  { %p707_p3 = scmp.ne.s32.totalorder %s880_s5, %s706_s28  ;;  %p710_p4 = scmp.lt.u32.totalorder %s706_s28, %s880_s5 }
 0x30a   :  { %p712_p5 = pnand %p710_p4, %p707_p3 }
 0x30c   :  { %715 = shalt.err (!%p712_p5)
}
 0x30d   :  { %428 = dma.vmem_to_hbm [thread:$0]  %s426_s16, 128, %s880_s5, [#allocation4]  }
 0x30e   :  { %722 = dma.done.wait [#allocation4], 128  }
 0x30f   :  { %723 = vsyncadd [#allocation4], 4294967168 }
 0x310   :  { %432 = vsyncpa [#allocation3], 1 }
 0x311   :  { %433 = vsyncpa [#allocation6], 1 }
 0x312   :  { %434 = vsyncpa [#allocation9], 1 }
 0x313   :  { %435 = vsyncpa [#allocation4], 1 }

</bundles_post_ra>
